<compile_context>
chip_gen: v6e
topology: v6e:2x2x1
jax: 0.10.0
libtpu: 0.0.40
codegen_flags: <defaults>
</compile_context>

<pallas_src>
import functools

import jax
import jax.numpy as jnp
from jax.experimental import pallas as pl
from jax.experimental.pallas import tpu as pltpu


# Pixels per grid step. Working set at T=8192 (x + h + out, double-buffered)
# is well under 2 MiB -> far below even v7x's 64 MiB VMEM.
_MAX_TILE_PIX = 8192


# ----------------------------- Pallas kernels --------------------------------

def _disc_single_kernel(x_ref, wfc_ref, bfc_ref, wh_ref, bh_ref, o_ref,
                        *, sigmoid):
    # x_ref:   (1, C_in, T)   pixels-on-lanes tile (NCHW native)
    # wfc_ref: (C_fc, C_in)   bf16 fc weight (PyTorch (out, in) layout)
    # bfc_ref: (C_fc, 1)      f32
    # wh_ref:  (C_head, C_fc) bf16 head weight
    # bh_ref:  (C_head, 1)    f32
    # o_ref:   (1, C_head, T) f32
    x = x_ref[0].astype(jnp.bfloat16)                               # (C_in, T)

    # fc: 1x1 conv + bias + ReLU (norm='none'; eval-mode dropout = identity).
    # K=4 / M=32 underutilizes the MXU but the kernel is HBM/overhead-bound,
    # so the matmul is nowhere near the critical path.
    h = jnp.dot(wfc_ref[...], x, preferred_element_type=jnp.float32)
    h = jnp.maximum(h + bfc_ref[...], 0.0).astype(jnp.bfloat16)      # (C_fc, T)

    y = jnp.dot(wh_ref[...], h, preferred_element_type=jnp.float32)
    y = y + bh_ref[...]                                              # (C_head, T)
    if sigmoid:
        y = jax.nn.sigmoid(y)
    o_ref[0] = y.astype(o_ref.dtype)


def _disc_both_kernel(x_ref, wfc_ref, bfc_ref, wg_ref, bg_ref, wc_ref, bc_ref,
                      gan_ref, cls_ref):
    x = x_ref[0].astype(jnp.bfloat16)                                # (C_in, T)
    h = jnp.dot(wfc_ref[...], x, preferred_element_type=jnp.float32)
    h = jnp.maximum(h + bfc_ref[...], 0.0).astype(jnp.bfloat16)      # (C_fc, T)

    g = jnp.dot(wg_ref[...], h, preferred_element_type=jnp.float32) + bg_ref[...]
    gan_ref[0] = jax.nn.sigmoid(g).astype(gan_ref.dtype)             # (1, T)

    c = jnp.dot(wc_ref[...], h, preferred_element_type=jnp.float32) + bc_ref[...]
    cls_ref[0] = c.astype(cls_ref.dtype)                             # (C_cls, T)


# ------------------------------ Grid helpers ---------------------------------

def _pick_tile(n, p):
    """Pick (tile, n_pixel_tiles). tile is either the full pixel dim or a
    128-aligned size, so every BlockSpec satisfies the (8,128) rule."""
    if p <= _MAX_TILE_PIX:
        if n == 1 and p >= 256 and p % 256 == 0:
            return p // 2, 2          # >=2 parallel steps for v7x's 2 TCs
        return p, 1                   # full-dim block, no padding needed
    tile = _MAX_TILE_PIX              # multiple of 128; partial last block is
    return tile, pl.cdiv(p, tile)     # masked by Pallas (no wrapper pad/slice)


def _weight_specs(c_fc, c_in, c_head):
    full = lambda b, t: (0, 0)        # invariant blocks, same tile every step
    return [
        pl.BlockSpec((c_fc, c_in), full),
        pl.BlockSpec((c_fc, 1), full),
        pl.BlockSpec((c_head, c_fc), full),
        pl.BlockSpec((c_head, 1), full),
    ]


def _run_single_head(x3, w_fc, b_fc, w_head, b_head, *, sigmoid):
    """x3: (N, C_in, P). Returns (N, C_head, P) float32."""
    n, c_in, p = x3.shape
    c_fc = w_fc.shape[0]
    c_head = w_head.shape[0]
    tile, p_tiles = _pick_tile(n, p)

    kernel = functools.partial(_disc_single_kernel, sigmoid=sigmoid)
    m_tot = n * p
    cost = pl.CostEstimate(
        flops=2 * m_tot * (c_in * c_fc + c_fc * c_head),
        transcendentals=m_tot * c_head if sigmoid else 0,
        bytes_accessed=(4 * m_tot * (c_in + c_head)
                        + 2 * (c_fc * c_in + c_head * c_fc)
                        + 4 * (c_fc + c_head)),
    )

    return pl.pallas_call(
        kernel,
        out_shape=jax.ShapeDtypeStruct((n, c_head, p), jnp.float32),
        grid_spec=pltpu.PrefetchScalarGridSpec(
            num_scalar_prefetch=0,
            grid=(n, p_tiles),
            in_specs=[pl.BlockSpec((1, c_in, tile), lambda b, t: (b, 0, t))]
                     + _weight_specs(c_fc, c_in, c_head),
            out_specs=pl.BlockSpec((1, c_head, tile), lambda b, t: (b, 0, t)),
        ),
        compiler_params=pltpu.CompilerParams(
            dimension_semantics=("parallel", "parallel")),
        cost_estimate=cost,
    )(x3, w_fc, b_fc, w_head, b_head)


def _run_both_heads(x3, w_fc, b_fc, w_gan, b_gan, w_cls, b_cls):
    """Fused path: one pass over x3 -> (sigmoid gan map, cls logits)."""
    n, c_in, p = x3.shape
    c_fc = w_fc.shape[0]
    c_cls = w_cls.shape[0]
    tile, p_tiles = _pick_tile(n, p)

    m_tot = n * p
    cost = pl.CostEstimate(
        flops=2 * m_tot * (c_in * c_fc + c_fc * (1 + c_cls)),
        transcendentals=m_tot,
        bytes_accessed=(4 * m_tot * (c_in + 1 + c_cls)
                        + 2 * (c_fc * c_in + (1 + c_cls) * c_fc)
                        + 4 * (c_fc + 1 + c_cls)),
    )

    full = lambda b, t: (0, 0)
    return pl.pallas_call(
        _disc_both_kernel,
        out_shape=(jax.ShapeDtypeStruct((n, 1, p), jnp.float32),
                   jax.ShapeDtypeStruct((n, c_cls, p), jnp.float32)),
        grid_spec=pltpu.PrefetchScalarGridSpec(
            num_scalar_prefetch=0,
            grid=(n, p_tiles),
            in_specs=[
                pl.BlockSpec((1, c_in, tile), lambda b, t: (b, 0, t)),
                pl.BlockSpec((c_fc, c_in), full),
                pl.BlockSpec((c_fc, 1), full),
                pl.BlockSpec((1, c_fc), full),
                pl.BlockSpec((1, 1), full),
                pl.BlockSpec((c_cls, c_fc), full),
                pl.BlockSpec((c_cls, 1), full),
            ],
            out_specs=(pl.BlockSpec((1, 1, tile), lambda b, t: (b, 0, t)),
                       pl.BlockSpec((1, c_cls, tile), lambda b, t: (b, 0, t))),
        ),
        compiler_params=pltpu.CompilerParams(
            dimension_semantics=("parallel", "parallel")),
        cost_estimate=cost,
    )(x3, w_fc, b_fc, w_gan, b_gan, w_cls, b_cls)


# ------------------------------ Module wrapper -------------------------------

class DiscriminatorPallas:
    """JAX/Pallas port of the PyTorch Discriminator (eval mode)."""

    def __init__(self, hp, key):
        c_in = hp["in_dim_fc"]
        c_fc = hp["out_dim_fc"]
        c_cls = hp["out_dim_cls"]
        k = jax.random.split(key, 6)
        s = 0.1
        # PyTorch Conv2d weights are (out, in, 1, 1); stored here as (out, in),
        # bf16 (native MXU input dtype). Biases stay f32.
        self.w_fc = (s * jax.random.normal(k[0], (c_fc, c_in))).astype(jnp.bfloat16)
        self.b_fc = (s * jax.random.normal(k[1], (c_fc, 1))).astype(jnp.float32)
        self.w_pred = (s * jax.random.normal(k[2], (1, c_fc))).astype(jnp.bfloat16)
        self.b_pred = (s * jax.random.normal(k[3], (1, 1))).astype(jnp.float32)
        self.w_cls = (s * jax.random.normal(k[4], (c_cls, c_fc))).astype(jnp.bfloat16)
        self.b_cls = (s * jax.random.normal(k[5], (c_cls, 1))).astype(jnp.float32)
        # TODO(synk): norm_fc != 'none' and train-mode dropout are not modeled;
        # eval-mode dropout is the identity.

    @staticmethod
    def _prep(feat_nchw):
        n, c, h, w = feat_nchw.shape
        # NCHW-native flatten: pure metadata reshape, no transpose, no padding.
        return feat_nchw.reshape(n, c, h * w), (n, h, w)

    def __call__(self, feat_nchw, mode):
        x3, (n, h, w) = self._prep(feat_nchw)
        if mode == "gan":
            y = _run_single_head(x3, self.w_fc, self.b_fc,
                                 self.w_pred, self.b_pred, sigmoid=True)
        elif mode == "cls":
            y = _run_single_head(x3, self.w_fc, self.b_fc,
                                 self.w_cls, self.b_cls, sigmoid=False)
        else:
            raise NotImplementedError(
                "Invalid mode %s for discriminator." % mode)
        return y.reshape(n, y.shape[1], h, w)      # contiguous -> free reshape

    def forward_both(self, feat_nchw):
        """One pass over feat produces (sigmoid gan map, cls logits)."""
        x3, (n, h, w) = self._prep(feat_nchw)
        gan, cls = _run_both_heads(x3, self.w_fc, self.b_fc,
                                   self.w_pred, self.b_pred,
                                   self.w_cls, self.b_cls)
        return gan.reshape(n, 1, h, w), cls.reshape(n, -1, h, w)


# ------------------------------- Reference -----------------------------------

def _ref_forward(feat, disc, mode):
    # Mirrors the kernel's bf16-operand / f32-accumulation math.
    x = feat.astype(jnp.bfloat16)
    h = jnp.einsum("oc,nchw->nohw", disc.w_fc, x,
                   preferred_element_type=jnp.float32)
    h = jnp.maximum(h + disc.b_fc.reshape(1, -1, 1, 1), 0.0).astype(jnp.bfloat16)
    if mode == "gan":
        y = jnp.einsum("oc,nchw->nohw", disc.w_pred, h,
                       preferred_element_type=jnp.float32)
        return jax.nn.sigmoid(y + disc.b_pred.reshape(1, -1, 1, 1))
    y = jnp.einsum("oc,nchw->nohw", disc.w_cls, h,
                   preferred_element_type=jnp.float32)
    return y + disc.b_cls.reshape(1, -1, 1, 1)


# --------------------------------- Driver ------------------------------------

if __name__ == "__main__":
    hp = {
        "in_dim_fc": 4,
        "out_dim_fc": 32,
        "out_dim_cls": 8,
        "norm_fc": "none",
        "activ_fc": "relu",
        "drop_fc": 0,
    }

    key = jax.random.PRNGKey(0)
    k_param, k_x = jax.random.split(key)

    disc = DiscriminatorPallas(hp, k_param)

    # feat: (N, C, H, W) = (2, 4, 16, 16) -> 256 pixels/image, grid = (2, 1)
    feat = jax.random.normal(k_x, (2, 4, 16, 16), dtype=jnp.float32)

    gan_out = disc(feat, "gan")             # (2, 1, 16, 16), values in (0, 1)
    cls_out = disc(feat, "cls")             # (2, 8, 16, 16)
    gan_f, cls_f = disc.forward_both(feat)  # fused single-pass variant

    jax.block_until_ready((gan_out, cls_out, gan_f, cls_f))

    assert gan_out.shape == (2, 1, 16, 16)
    assert cls_out.shape == (2, hp["out_dim_cls"], 16, 16)
    assert bool(jnp.all((gan_out > 0.0) & (gan_out < 1.0)))

    gan_ref = _ref_forward(feat, disc, "gan")
    cls_ref = _ref_forward(feat, disc, "cls")
    assert bool(jnp.allclose(gan_out, gan_ref, rtol=1e-3, atol=1e-4))
    assert bool(jnp.allclose(cls_out, cls_ref, rtol=1e-3, atol=1e-4))
    assert bool(jnp.allclose(gan_f, gan_out, rtol=1e-3, atol=1e-5))
    assert bool(jnp.allclose(cls_f, cls_out, rtol=1e-3, atol=1e-5))

    print("KERNEL_OK")
</pallas_src>

<mosaic_0001>
module attributes {stable_mosaic.version = 11 : i64} {
  func.func @_disc_single_kernel(%arg0: i32, %arg1: i32, %arg2: memref<1x4x256xf32, #tpu.memory_space<vmem>>, %arg3: memref<32x4xbf16, #tpu.memory_space<vmem>>, %arg4: memref<32x1xf32, #tpu.memory_space<vmem>>, %arg5: memref<1x32xbf16, #tpu.memory_space<vmem>>, %arg6: memref<1x1xf32, #tpu.memory_space<vmem>>, %arg7: memref<1x1x256xf32, #tpu.memory_space<vmem>>) attributes {dimension_semantics = [#tpu.dimension_semantics<parallel>, #tpu.dimension_semantics<parallel>], iteration_bounds = array<i64: 2, 1>, scalar_prefetch = 0 : i64, scratch_operands = 0 : i64, tpu.core_type = #tpu.core_type<tc>, window_params = [{transform_indices = @transform_0, window_bounds = array<i64: 1, 4, 256>}, {pipeline_mode = #tpu.pipeline_mode<synchronous>, transform_indices = @transform_1, window_bounds = array<i64: 32, 4>}, {pipeline_mode = #tpu.pipeline_mode<synchronous>, transform_indices = @transform_2, window_bounds = array<i64: 32, 1>}, {pipeline_mode = #tpu.pipeline_mode<synchronous>, transform_indices = @transform_3, window_bounds = array<i64: 1, 32>}, {pipeline_mode = #tpu.pipeline_mode<synchronous>, transform_indices = @transform_4, window_bounds = array<i64: 1, 1>}, {transform_indices = @transform_5, window_bounds = array<i64: 1, 1, 256>}]} {
    %c0 = arith.constant 0 : index
    %c0_0 = arith.constant 0 : index
    %c0_1 = arith.constant 0 : index
    %0 = vector.load %arg2[%c0, %c0_0, %c0_1] : memref<1x4x256xf32, #tpu.memory_space<vmem>>, vector<1x4x256xf32>
    %1 = vector.shape_cast %0 : vector<1x4x256xf32> to vector<4x256xf32>
    %2 = arith.truncf %1 : vector<4x256xf32> to vector<4x256xbf16>
    %c0_2 = arith.constant 0 : index
    %c0_3 = arith.constant 0 : index
    %3 = vector.load %arg3[%c0_2, %c0_3] : memref<32x4xbf16, #tpu.memory_space<vmem>>, vector<32x4xbf16>
    %cst = arith.constant dense<0.000000e+00> : vector<32x256xf32>
    %4 = tpu.matmul %3, %2, %cst {dimension_numbers = #tpu.dot_dimension_numbers<[1], [0], [0], [1], [0, 0, 1, 1], [], []>} : vector<32x4xbf16>, vector<4x256xbf16>, vector<32x256xf32> -> vector<32x256xf32>
    %c0_4 = arith.constant 0 : index
    %c0_5 = arith.constant 0 : index
    %5 = vector.load %arg4[%c0_4, %c0_5] : memref<32x1xf32, #tpu.memory_space<vmem>>, vector<32x1xf32>
    %6 = vector.broadcast %5 : vector<32x1xf32> to vector<32x256xf32>
    %7 = arith.addf %4, %6 : vector<32x256xf32>
    %cst_6 = arith.constant 0.000000e+00 : f32
    %8 = vector.broadcast %cst_6 : f32 to vector<32x256xf32>
    %9 = arith.maximumf %7, %8 : vector<32x256xf32>
    %10 = arith.truncf %9 : vector<32x256xf32> to vector<32x256xbf16>
    %c0_7 = arith.constant 0 : index
    %c0_8 = arith.constant 0 : index
    %11 = vector.load %arg5[%c0_7, %c0_8] : memref<1x32xbf16, #tpu.memory_space<vmem>>, vector<1x32xbf16>
    %cst_9 = arith.constant dense<0.000000e+00> : vector<1x256xf32>
    %12 = tpu.matmul %11, %10, %cst_9 {dimension_numbers = #tpu.dot_dimension_numbers<[1], [0], [0], [1], [0, 0, 1, 1], [], []>} : vector<1x32xbf16>, vector<32x256xbf16>, vector<1x256xf32> -> vector<1x256xf32>
    %c0_10 = arith.constant 0 : index
    %c0_11 = arith.constant 0 : index
    %13 = vector.load %arg6[%c0_10, %c0_11] : memref<1x1xf32, #tpu.memory_space<vmem>>, vector<1x1xf32>
    %14 = vector.broadcast %13 : vector<1x1xf32> to vector<1x256xf32>
    %15 = arith.addf %12, %14 : vector<1x256xf32>
    %16 = arith.negf %15 : vector<1x256xf32>
    %17 = math.exp %16 : vector<1x256xf32>
    %cst_12 = arith.constant 1.000000e+00 : f32
    %18 = vector.broadcast %cst_12 : f32 to vector<1x256xf32>
    %19 = arith.addf %18, %17 : vector<1x256xf32>
    %20 = arith.divf %18, %19 : vector<1x256xf32>
    %c0_13 = arith.constant 0 : index
    %c0_14 = arith.constant 0 : index
    %c0_15 = arith.constant 0 : index
    %21 = vector.load %arg7[%c0_13, %c0_14, %c0_15] : memref<1x1x256xf32, #tpu.memory_space<vmem>>, vector<1x1x256xf32>
    %22 = vector.shape_cast %21 : vector<1x1x256xf32> to vector<1x256xf32>
    %23 = vector.shape_cast %20 : vector<1x256xf32> to vector<1x1x256xf32>
    tpu.vector_store %arg7[%c0_13, %c0_14, %c0_15], %23 {strides = array<i32>} : memref<1x1x256xf32, #tpu.memory_space<vmem>>, vector<1x1x256xf32>,
    return
  }
  func.func @transform_0(%arg0: i32, %arg1: i32) -> (i32, i32, i32) {
    %c0_i32 = arith.constant 0 : i32
    %c0_i32_0 = arith.constant 0 : i32
    return %arg0, %c0_i32, %arg1 : i32, i32, i32
  }
  func.func @transform_1(%arg0: i32, %arg1: i32) -> (i32, i32) {
    %c0_i32 = arith.constant 0 : i32
    %c0_i32_0 = arith.constant 0 : i32
    %c0_i32_1 = arith.constant 0 : i32
    return %c0_i32, %c0_i32_0 : i32, i32
  }
  func.func @transform_2(%arg0: i32, %arg1: i32) -> (i32, i32) {
    %c0_i32 = arith.constant 0 : i32
    %c0_i32_0 = arith.constant 0 : i32
    %c0_i32_1 = arith.constant 0 : i32
    return %c0_i32, %c0_i32_0 : i32, i32
  }
  func.func @transform_3(%arg0: i32, %arg1: i32) -> (i32, i32) {
    %c0_i32 = arith.constant 0 : i32
    %c0_i32_0 = arith.constant 0 : i32
    %c0_i32_1 = arith.constant 0 : i32
    return %c0_i32, %c0_i32_0 : i32, i32
  }
  func.func @transform_4(%arg0: i32, %arg1: i32) -> (i32, i32) {
    %c0_i32 = arith.constant 0 : i32
    %c0_i32_0 = arith.constant 0 : i32
    %c0_i32_1 = arith.constant 0 : i32
    return %c0_i32, %c0_i32_0 : i32, i32
  }
  func.func @transform_5(%arg0: i32, %arg1: i32) -> (i32, i32, i32) {
    %c0_i32 = arith.constant 0 : i32
    %c0_i32_0 = arith.constant 0 : i32
    return %arg0, %c0_i32, %arg1 : i32, i32, i32
  }
}

</mosaic_0001>

<bundles_post_ra>
// kernel: tpu_custom_call.1
= control target key start
LH: loop header
LB: loop body
LE: loop exit
PB: predicated region body
PF: predicated region fallthrough
CT: control target
= control target key end

     0   :  { %s891_s0 = inlined_call_operand.vmem [shape: f32[2,4,256], index: 0, kind: input, shape index: {}]   ;;  %s892_s1 = inlined_call_operand.vmem [shape: bf16[32,4], index: 1, kind: input, shape index: {}]   ;;  %s893_s2 = inlined_call_operand.vmem [shape: f32[32,1], index: 2, kind: input, shape index: {}]   ;;  %s894_s3 = inlined_call_operand.vmem [shape: bf16[1,32], index: 3, kind: input, shape index: {}]   ;;  %s895_s4 = inlined_call_operand.<no memory space> [shape: f32[1,1], index: 4, kind: input, shape index: {}]   ;;  %s896_s5 = inlined_call_operand.hbm [shape: f32[2,1,256], index: 5, kind: output, shape index: {}]  }
   0x1   :  { %v10_v0 = vstv %s895_s4 }
   0x2   :  { %11 = vst [vmem:[#allocation2] sm:$0x1] %v10_v0 }
   0x3   :  { %12 = vsyncpa [#allocation4], 0 }
   0x4   :  { %14 = vsyncpa [#allocation4 + $0x1], 0  ;;  %s771_s20 = smov 0   ;;  %s773_s21 = smov 0  }
   0x5   :  { %s775_s22 = smov 0   ;;  %s777_s23 = smov 0  }
   0x6   :  { %s779_s24 = smov 0   ;;  %s781_s25 = smov 0  }
   0x7 LB: > { %s564_s4 = sadd.s32 4294967295, %s733_s25   ;;  %s565_s26 = sadd.s32 4294967294, %s733_s25   ;;  %s733_s25 = sphi %s781_s25, %s20_s25   ;;  %s729_s24 = sphi %s779_s24, %s903_s24   ;;  %s725_s23 = sphi %s777_s23, %s902_s23   ;;  %s721_s22 = sphi %s775_s22, %s901_s22   ;;  %s717_s21 = sphi %s773_s21, %s900_s21   ;;  %s713_s20 = sphi %s771_s20, %s899_s20  }
   0x8   : > { %s32_s27 = sadd.s32 1, %s729_s24  ;;  %s153_s28 = sadd.s32 1, %s721_s22 }
   0x9   : > { %p34_p0 = scmp.ge.s32.totalorder %s32_s27, 2  ;;  %p163_p1 = scmp.ne.s32.totalorder %s721_s22, %s717_s21 }
   0xa   : > { %p164_p2 = scmp.eq.s32.totalorder %s564_s4, 1  ;;  %p169_p3 = scmp.ne.s32.totalorder %s717_s21, %s713_s20 }
   0xb   : > { %s905_s27 = smov (%p34_p0, %s32_s27), 0  ;;  %p170_p5 = scmp.eq.s32.totalorder %s565_s26, 1 }
   0xc   : > { %p811_p4 = por %p164_p2, %p163_p1  ;;  %s148_s30 = ssub.s32 %s729_s24, %s905_s27 }
   0xd   : > { %p568_p6 = scmp.ge.s32.totalorder %s733_s25, 1  ;;  %p151_p7 = scmp.eq.s32.totalorder %s148_s30, 0 }
   0xe   : > { %p818_p8 = por %p170_p5, %p169_p3  ;;  %p213_p9 = scmp.lt.s32.totalorder %s733_s25, 3 }
   0xf   : > { %s824_s7 = scalar_select %p151_p7, %s721_s22, %s153_s28  }
  0x10   : > { %p214_p10 = pnand %p568_p6, %p213_p9 }
  0x11   : > { %p246_p11 = scmp.lt.s32.totalorder (!%p214_p10), %s725_s23, 1  ;;  %s242_s11 = sand.u32 (!%p214_p10), 1, %s717_s21  }
  0x12   : > { %217 = sbr.rel (%p214_p10) target bundleno = 505 (0x1f9), region = 40  ;;  %s569_s12 = sshll.u32 (!%p214_p10), %s242_s11, 1 }
  0x13   : > { %s244_s14 = scalar_lea.vmem (!%p214_p10), [#allocation3], %s569_s12  ;;  %s472_s19 = scalar_lea.sflag (!%p214_p10), [#allocation4], %s242_s11 }
  0x14   : > { %s488_s15 = sshll.u32 (!%p214_p10), %s244_s14, 4  ;;  %s737_s26 = smov (!%p214_p10), [#allocation3]   ;;  %s489_s15 = int_to_ptr.vmem [resolvable:$true] %s488_s15 }
  0x15   : > { %s661_s28 = sshll.u32 (!%p214_p10), %s737_s26, 4  ;;  %s662_s28 = int_to_ptr.vmem [resolvable:$false] %s661_s28 }
  0x16   : > { %p664_p1 = scmp.lt.s32.totalorder (!%p214_p10), %s489_s15, %s662_s28 }
  0x17   : > { %v735_v1 = vmov 0   ;;  %s247_s8 = scalar_select %p246_p11, %s725_s23, 1  ;;  %v267_v2 = vld [vmem:[%s893_s2] sm:$0xff]  ;;  %v269_v3 = vld [vmem:[%s893_s2 + $0x10] sm:$0xff]  ;;  %v268_v4 = vld [vmem:[%s893_s2 + $0x8] sm:$0xff]  ;;  %vm308_vm0 = vcmask 1041408   ;;  %v387_v47 = vlaneseq }
  0x18   : > { %347 = vmatprep.mubr.bf16.mxu0 %v735_v1  ;;  %645 = vset.pattern.permute.xlu1 %v735_v1  ;;  %v270_v5 = vld [vmem:[%s893_s2 + $0x18] sm:$0xff]  ;;  %v381_v9 = vld [vmem:[#allocation2] sm:$0x1]  ;;  %vm301_vm1 = vcmask 31744   ;;  %v648_v13 = vld [vmem:[%s892_s1 + $0x8] sm:$0xff]   ;;  %vm391_vm2 = vcmask 261120  }
  0x19   : > { %644 = vset.pattern.permute.xlu0 %v735_v1  ;;  %427 = vmatprep.mubr.bf16.mxu1 %v735_v1  ;;  %s585_s13 = sshll.u32 %s247_s8, 3  ;;  %v647_v12 = vld [vmem:[%s892_s1] sm:$0xff]   ;;  %v388_v48 = vshrl.u32 %v387_v47, 7  ;;  %v736_v0 = vmov 1966171168   ;;  %vm468_vm3 = vcmp.lt.s32.totalorder %v387_v47, 256 }
  0x1a   : > { %273 = vperm.xlu1 %645, %v267_v2   ;;  %283 = vperm.xlu0 %644, %v269_v3   ;;  %s253_s4 = scalar_lea.vmem %s891_s0, %s585_s13  ;;  %v380_v46 = vld [vmem:[%s894_s3] sm:$0x1]  ;;  %s586_s13 = sshll.u32 %s725_s23, 5 }
  0x1b   : > { %v257_v6 = vld [vmem:[%s253_s4] sm:$0xff]  ;;  %v389_v49 = vsub.s32 0, %v388_v48  ;;  %s486_s18 = scalar_lea.hbm %s896_s5, %s586_s13  ;;  %s657_s4 = scalar_lea.vmem %s489_s15, 32 }
  0x1c   : > { %v259_v7 = vcombine.high %v257_v6, %v257_v6  ;;  %v261_v8 = vpack.c.bf16 %v257_v6, %v257_v6  ;;  %p658_p12 = scmp.ne.s32.totalorder %s489_s15, %s657_s4  ;;  %s663_s23 = scalar_lea.vmem %s662_s28, 64 }
  0x1d   : > { %p665_p2 = scmp.lt.s32.totalorder %s663_s23, %s657_s4 }
  0x1e   : > { %278 = vperm.xlu1 %645, %v268_v4   ;;  %288 = vperm.xlu0 %644, %v270_v5   ;;  %v262_v10 = vpack.c.bf16 %v259_v7, %v259_v7  ;;  %v310_v11 = vsel %vm308_vm0, %v261_v8, 0  ;;  %p659_p13 = pnand %p658_p12, %p811_p4 }
  0x1f   : > { %p666_p3 = por %p665_p2, %p664_p1 }
  0x20   : > { %574 = vmatprep.subr.msk.bf16.mxu0 %vm308_vm0, %v262_v10  ;;  %p660_p0 = pneg %p659_p13 }
  0x21   : > { %330 = vmatpush1.bf16.msra.mxu0 %v310_v11 }
  0x22   : > { %384 = vperm.xlu0 %644, %v381_v9   ;;  %p667_p5 = pnand %p666_p3, %p660_p0 }
  0x24   : > { %575 = vmatmul.mubr.msk.bf16.vlgmr.msra.gmra.mxu0 %vm301_vm1, %v647_v12 }
  0x25   : > { %357 = vmatprep.mubr.bf16.mxu0 %v735_v1  ;;  %v452_v1 = vunpack.c.l.s4 %v736_v0 }
  0x27   : > { %v453_v2 = vunpack.c.0.s8 %v452_v1 }
  0x29   : > { %v456_v4 = vsub.s32 %v453_v2, %v388_v48 }
  0x2c   : > { %576 = vmatmul.mubr.msk.bf16.gmra.mxu0 %vm301_vm1, %v648_v13 }
  0x95   : > { %v274_v17 = vpop.permute.xlu1 %273  ;;  %v284_v18 = vpop.permute.xlu0 %283 }
  0x99   : > { %v279_v22 = vpop.permute.xlu1 %278  ;;  %v289_v23 = vpop.permute.xlu0 %288 }
  0x9d   : > { %v385_v50 = vpop.permute.xlu0 %384 }
  0x9e   : > { %v390_v51 = vrot.slane %v385_v50, %v389_v49 }
  0xe4   : > { %v349_v14 = vpop.f32.mrf.mxu0 }
  0xe5   : > { %v350_v37 = vadd.f32 %v349_v14, %v274_v17 }
  0xe6   : > { %v351_v15 = vpop.f32.mrf.mxu0 }
  0xe7   : > { %v352_v30 = vadd.f32 %v351_v15, %v274_v17  ;;  %v368_v44 = vmax.f32 %v350_v37, 0.0 }
  0xe8   : > { %v353_v16 = vpop.f32.mrf.mxu0 }
  0xe9   : > { %v354_v32 = vadd.f32 %v353_v16, %v279_v22  ;;  %v369_v39 = vmax.f32 %v352_v30, 0.0 }
  0xea   : > { %v355_v19 = vpop.f32.mrf.mxu0 }
  0xeb   : > { %v356_v25 = vadd.f32 %v355_v19, %v279_v22  ;;  %v370_v41 = vmax.f32 %v354_v32, 0.0 }
  0xec   : > { %v359_v20 = vpop.f32.mrf.mxu0 }
  0xed   : > { %v360_v28 = vadd.f32 %v359_v20, %v284_v18  ;;  %v371_v34 = vmax.f32 %v356_v25, 0.0  ;;  %v376_v45 = vpack.c.bf16 %v370_v41, %v368_v44 }
  0xee   : > { %v361_v21 = vpop.f32.mrf.mxu0 }
  0xef   : > { %v362_v26 = vadd.f32 %v361_v21, %v284_v18  ;;  %v372_v38 = vmax.f32 %v360_v28, 0.0  ;;  %v377_v43 = vpack.c.bf16 %v371_v34, %v369_v39 }
  0xf0   : > { %v363_v24 = vpop.f32.mrf.mxu0 }
  0xf1   : > { %v364_v27 = vadd.f32 %v363_v24, %v289_v23  ;;  %v373_v35 = vmax.f32 %v362_v26, 0.0 }
  0xf2   : > { %v365_v29 = vpop.f32.mrf.mxu0 }
  0xf3   : > { %v366_v31 = vadd.f32 %v365_v29, %v289_v23  ;;  %v374_v33 = vmax.f32 %v364_v27, 0.0 }
  0xf5   : > { %v375_v36 = vmax.f32 %v366_v31, 0.0  ;;  %v378_v42 = vpack.c.bf16 %v374_v33, %v372_v38 }
  0xf7   : > { %v379_v40 = vpack.c.bf16 %v375_v36, %v373_v35 }
  0xf9   : > { %407 = vmatprep.subr.bf16.mxu1 %v379_v40 }
  0xfa   : > { %408 = vmatpush1.bf16.msra.mxu1 %v378_v42 }
  0xfb   : > { %409 = vmatprep.subr.bf16.mxu1 %v377_v43 }
  0xfe   : > { %410 = vmatpush1.bf16.msra.mxu1 %v376_v45 }
 0x101   : > { %577 = vmatmul.mubr.msk.bf16.vlgmr.msra.gmra.mxu1 %vm391_vm2, %v380_v46 }
 0x1c1   : > { %v429_v52 = vpop.f32.mrf.mxu1 }
 0x1c2   : > { %v430_v53 = vadd.f32 %v429_v52, %v390_v51 }
 0x1c3   : > { %v431_v54 = vpop.f32.mrf.mxu1 }
 0x1c4   : > { %v578_v55 = vmul.f32 -1.442695, %v430_v53  ;;  %v432_v56 = vadd.f32 %v431_v54, %v390_v51 }
 0x1c5   : > { %v433_v57 = vpop.f32.mrf.mxu1 }
 0x1c6   : > { %649 = vpow2.f32 %v578_v55  ;;  %v579_v58 = vmul.f32 -1.442695, %v432_v56 }
 0x1c7   : > { %v434_v59 = vpop.f32.mrf.mxu1 }
 0x1c8   : > { %651 = vpow2.f32 %v579_v58 }
 0x1d3   : > { %v650_v60 = vpop.eup %649 }
 0x1d4   : > { %v442_v61 = vadd.f32 1.0, %v650_v60 }
 0x1d5   : > { %v652_v62 = vpop.eup %651 }
 0x1d6   : > { %v443_v63 = vadd.f32 1.0, %v652_v62  ;;  %653 = vrcp.f32 %v442_v61 }
 0x1d8   : > { %655 = vrcp.f32 %v443_v63 }
 0x1e3   : > { %v654_v3 = vpop.eup %653 }
 0x1e5   : > { %v656_v5 = vpop.eup %655 }
 0x1e6   : > { %v450_v6 = vcombine.low %v654_v3, %v656_v5 }
 0x1e8   : > { %v457_v7 = vrot.slane %v450_v6, %v456_v4 }
 0x1ea   : > { %v464_v8 = vrot.slane %v457_v7, %v456_v4 }
 0x1ec   : > { %470 = vst.msk [vmem:[%s244_s14] sm:$0x3] %vm468_vm3, %v464_v8 }
 0x1ed   : > { %670 = shalt.err (!%p667_p5)
}
 0x1ee   : > { %s671_s30 = scalar_lea.hbm %s486_s18, 32  ;;  %s675_s10 = scalar_lea.hbm %s896_s5, 64 }
 0x1ef   : > { %p672_p6 = scmp.ne.s32.totalorder %s486_s18, %s671_s30  ;;  %p676_p10 = scmp.lt.s32.totalorder %s486_s18, %s896_s5 }
 0x1f0   : > { %p677_p11 = scmp.lt.s32.totalorder %s675_s10, %s671_s30 }
 0x1f1   : > { %p673_p7 = pnand %p672_p6, %p811_p4 }
 0x1f2   : > { %p678_p12 = por %p677_p11, %p676_p10 }
 0x1f3   : > { %p674_p9 = pneg %p673_p7 }
 0x1f5   : > { %p679_p13 = pnand %p678_p12, %p674_p9 }
 0x1f7   : > { %682 = shalt.err (!%p679_p13)
}
 0x1f8   : > { %587 = dma.vmem_to_hbm [thread:$0]  (%p811_p4), %s489_s15, 32, %s486_s18, %s472_s19  }
 0x1f9 PF: > { %p593_p0 = scmp.ge.s32.totalorder %s733_s25, 2  ;;  %s500_s13 = sand.u32 1, %s713_s20  }
 0x1fa   : > { %s501_s14 = scalar_lea.sflag [#allocation4], %s500_s13 }
 0x1fb   : > { %p590_p1 = pnand %p593_p0, %p818_p8 }
 0x1fd   : > { %p591_p2 = pneg %p590_p1 }
 0x1ff   : > { %708 = dma.done.wait (%p591_p2), %s501_s14, 32  }
 0x200   : > { %710 = vsyncadd (%p591_p2), %s501_s14, 4294967264  ;;  %s20_s25 = sadd.s32 1, %s733_s25   ;;  %s899_s20 = smov %s717_s21 }
 0x201   : > { %p17_p3 = scmp.ge.s32.totalorder %s20_s25, 4   ;;  %s900_s21 = smov %s721_s22 }
 0x202   : > { %s901_s22 = smov %s824_s7  ;;  %s902_s23 = smov %s729_s24 }
 0x203   : > { %s903_s24 = smov %s905_s27  ;;  %19 = sbr.rel (!%p17_p3) target bundleno = 7 (0x7), region = 75 }
 0x208   :  { %506 = vsyncpa [#allocation4], 1 }
 0x209   :  { %508 = vsyncpa [#allocation4 + $0x1], 1 }

</bundles_post_ra>
